<compile_context>
chip_gen: v5e
topology: v5e:2x2
jax: 0.10.0
libtpu: 0.0.40
codegen_flags: <defaults>
</compile_context>

<pallas_src>
import functools

import jax
import jax.numpy as jnp
from jax.experimental import pallas as pl
from jax.experimental.pallas import tpu as pltpu

NEG_SLOPE = 0.01  # nn.LeakyReLU default


def _leaky_relu(x):
    return jnp.where(x > 0, x, NEG_SLOPE * x)


def flow_scn_kernel(L_ref, X_ref, pool_ref,
                    w1_ref, w2_ref, w3_ref, w4_ref,
                    m1w_ref, m1b_ref, m2w_ref, m2b_ref,
                    out_ref):
    bf16 = jnp.bfloat16
    L = L_ref[...]                       # [E, E]  bf16
    h = X_ref[...]                       # [E, F]  bf16

    def scn_layer(h, W):
        # chebyshev(L, h, k=1) == L @ h ; then Linear (bias=False), then LeakyReLU.
        # bf16 operands on the MXU, f32 accumulation; elementwise stays f32.
        Lh = jnp.dot(L, h.astype(bf16), preferred_element_type=jnp.float32)
        y = jnp.dot(Lh.astype(bf16), W, preferred_element_type=jnp.float32)
        return _leaky_relu(y)

    h = scn_layer(h, w1_ref[...])
    h = scn_layer(h, w2_ref[...])
    h = scn_layer(h, w3_ref[...])
    h = scn_layer(h, w4_ref[...])

    # global_mean_pool(|h|, batch): pool matrix is pre-normalized (onehot / count)
    # in the wrapper, so this is a single MXU matmul.
    pooled = jnp.dot(pool_ref[...], jnp.abs(h).astype(bf16),
                     preferred_element_type=jnp.float32)          # [B, 32] f32

    # mlp1 + ReLU (bias in f32)
    z = jnp.dot(pooled.astype(bf16), m1w_ref[...],
                preferred_element_type=jnp.float32) + m1b_ref[...]
    z = jnp.maximum(z, 0.0)

    # mlp2 (lane-padded to 128 output columns; padded bias = -1e30 so padded
    # columns softmax to exactly 0) + softmax over dim=1.
    logits = jnp.dot(z.astype(bf16), m2w_ref[...],
                     preferred_element_type=jnp.float32) + m2b_ref[...]
    m = jnp.max(logits, axis=1, keepdims=True)
    e = jnp.exp(logits - m)
    out_ref[...] = e / jnp.sum(e, axis=1, keepdims=True)           # [B, 128] lane-dense store


def _prepare_inputs(L1, X1, batch, params, num_graphs, output_size):
    """Glue done in JAX: one-hot pooling matrix (pre-normalized), bf16 casts,
    lane-padding of the mlp2 head."""
    bf16, f32 = jnp.bfloat16, jnp.float32
    conv_size = params["mlp1_w"].shape[0]
    pad_n = ((output_size + 127) // 128) * 128          # lane-dense output width

    oh = (batch[None, :] == jnp.arange(num_graphs, dtype=batch.dtype)[:, None]).astype(f32)
    counts = jnp.maximum(jnp.sum(oh, axis=1, keepdims=True), 1.0)   # zero-edge guard
    pool = (oh / counts).astype(bf16)                               # [B, E]

    m2w_pad = jnp.zeros((conv_size, pad_n), f32).at[:, :output_size].set(
        params["mlp2_w"]).astype(bf16)
    m2b_pad = jnp.full((1, pad_n), -1e30, f32).at[:, :output_size].set(
        params["mlp2_b"])

    inputs = (L1.astype(bf16), X1.astype(bf16), pool,
              params["w1"].astype(bf16), params["w2"].astype(bf16),
              params["w3"].astype(bf16), params["w4"].astype(bf16),
              params["mlp1_w"].astype(bf16), params["mlp1_b"].astype(f32),
              m2w_pad, m2b_pad)
    return inputs, pad_n


@functools.partial(jax.jit, static_argnames=("num_graphs", "output_size"))
def flow_scn_forward(L1, X1, batch, params, *, num_graphs, output_size):
    inputs, pad_n = _prepare_inputs(L1, X1, batch, params, num_graphs, output_size)
    out_pad = pl.pallas_call(
        flow_scn_kernel,
        out_shape=jax.ShapeDtypeStruct((num_graphs, pad_n), jnp.float32),
        in_specs=[pl.BlockSpec(memory_space=pltpu.MemorySpace.VMEM) for _ in inputs],
        out_specs=pl.BlockSpec(memory_space=pltpu.MemorySpace.VMEM),
    )(*inputs)
    return out_pad[:, :output_size]


def flow_scn_reference_bf16(L1, X1, batch, params, *, num_graphs, output_size):
    """Pure-JAX reference doing the exact same bf16-operand / f32-accum math as
    the kernel (for a tight correctness check)."""
    bf16 = jnp.bfloat16
    inputs, _ = _prepare_inputs(L1, X1, batch, params, num_graphs, output_size)
    (L, X, pool, w1, w2, w3, w4, m1w, m1b, m2w, m2b) = inputs
    h = X
    for w in (w1, w2, w3, w4):
        Lh = jnp.dot(L, h.astype(bf16), preferred_element_type=jnp.float32)
        h = _leaky_relu(jnp.dot(Lh.astype(bf16), w, preferred_element_type=jnp.float32))
    pooled = jnp.dot(pool, jnp.abs(h).astype(bf16), preferred_element_type=jnp.float32)
    z = jnp.maximum(jnp.dot(pooled.astype(bf16), m1w,
                            preferred_element_type=jnp.float32) + m1b, 0.0)
    logits = jnp.dot(z.astype(bf16), m2w, preferred_element_type=jnp.float32) + m2b
    return jax.nn.softmax(logits, axis=1)[:, :output_size]


def flow_scn_reference_f32(L1, X1, batch, params, *, num_graphs):
    """Full-f32 reference of the original PyTorch math (loose sanity check)."""
    oh = (batch[None, :] == jnp.arange(num_graphs, dtype=batch.dtype)[:, None]).astype(jnp.float32)
    counts = jnp.maximum(oh.sum(axis=1, keepdims=True), 1.0)
    h = X1
    for w in (params["w1"], params["w2"], params["w3"], params["w4"]):
        h = _leaky_relu((L1 @ h) @ w)
    pooled = (oh @ jnp.abs(h)) / counts
    z = jnp.maximum(pooled @ params["mlp1_w"] + params["mlp1_b"], 0.0)
    return jax.nn.softmax(z @ params["mlp2_w"] + params["mlp2_b"], axis=1)


if __name__ == "__main__":
    # Small, FlowSCN-consistent shapes.
    E = 64                 # number of edges (1-simplices)
    num_edge_feats = 8     # edge feature size
    conv_size = 32         # fixed in FlowSCN.__init__
    output_size = 4
    num_graphs = 2         # batch of simplicial complexes

    key = jax.random.PRNGKey(0)
    k_l, k_x, k1, k2, k3, k4, k5, k6, k7, k8 = jax.random.split(key, 10)

    # Synthetic (dense, symmetric) edge Laplacian L1 and edge features X1.
    A = jax.random.normal(k_l, (E, E), dtype=jnp.float32) * 0.1
    L1 = 0.5 * (A + A.T)
    X1 = jax.random.normal(k_x, (E, num_edge_feats), dtype=jnp.float32)

    # batch[1]: graph id per edge.
    batch = jnp.concatenate(
        [jnp.zeros((E // 2,), jnp.int32), jnp.ones((E - E // 2,), jnp.int32)])

    def lin_w(k, fan_in, fan_out):
        # PyTorch nn.Linear stores weight as [out, in]; kernel uses [in, out] (x @ W).
        bound = 1.0 / jnp.sqrt(fan_in)
        return jax.random.uniform(k, (fan_in, fan_out), jnp.float32, -bound, bound)

    params = {
        # SCN layers: Linear(k*feature_size, conv_size, bias=False)
        "w1": lin_w(k1, num_edge_feats, conv_size),
        "w2": lin_w(k2, conv_size, conv_size),
        "w3": lin_w(k3, conv_size, conv_size),
        "w4": lin_w(k4, conv_size, conv_size),
        # MLP head (with bias), biases kept 2-D [1, C] for lane-friendly layout.
        "mlp1_w": lin_w(k5, conv_size, conv_size),
        "mlp1_b": jax.random.uniform(k6, (1, conv_size), jnp.float32,
                                     -1.0 / jnp.sqrt(conv_size), 1.0 / jnp.sqrt(conv_size)),
        "mlp2_w": lin_w(k7, conv_size, output_size),
        "mlp2_b": jax.random.uniform(k8, (1, output_size), jnp.float32,
                                     -1.0 / jnp.sqrt(conv_size), 1.0 / jnp.sqrt(conv_size)),
    }

    out = flow_scn_forward(L1, X1, batch, params,
                           num_graphs=num_graphs, output_size=output_size)
    out = jax.block_until_ready(out)
    assert out.shape == (num_graphs, output_size)

    # Tight check: same bf16-operand math in pure JAX.
    ref_bf16 = flow_scn_reference_bf16(L1, X1, batch, params,
                                       num_graphs=num_graphs, output_size=output_size)
    assert jnp.allclose(out, ref_bf16, atol=1e-3, rtol=1e-3), (out, ref_bf16)

    # Loose sanity check vs the full-f32 reference (bf16 precision loss only).
    ref_f32 = flow_scn_reference_f32(L1, X1, batch, params, num_graphs=num_graphs)
    assert jnp.allclose(out, ref_f32, atol=1e-1, rtol=1e-1), (out, ref_f32)

    assert jnp.allclose(out.sum(axis=1), 1.0, atol=1e-5)

    print("KERNEL_OK")
</pallas_src>

<mosaic_0001>
module attributes {stable_mosaic.version = 11 : i64} {
  func.func @flow_scn_kernel(%arg0: memref<64x64xbf16, #tpu.memory_space<vmem>>, %arg1: memref<64x8xbf16, #tpu.memory_space<vmem>>, %arg2: memref<2x64xbf16, #tpu.memory_space<vmem>>, %arg3: memref<8x32xbf16, #tpu.memory_space<vmem>>, %arg4: memref<32x32xbf16, #tpu.memory_space<vmem>>, %arg5: memref<32x32xbf16, #tpu.memory_space<vmem>>, %arg6: memref<32x32xbf16, #tpu.memory_space<vmem>>, %arg7: memref<32x32xbf16, #tpu.memory_space<vmem>>, %arg8: memref<1x32xf32, #tpu.memory_space<vmem>>, %arg9: memref<32x128xbf16, #tpu.memory_space<vmem>>, %arg10: memref<1x128xf32, #tpu.memory_space<vmem>>, %arg11: memref<2x128xf32, #tpu.memory_space<vmem>>) attributes {dimension_semantics = [], scalar_prefetch = 0 : i64, scratch_operands = 0 : i64, tpu.core_type = #tpu.core_type<tc>} {
    %c0 = arith.constant 0 : index
    %c0_0 = arith.constant 0 : index
    %0 = vector.load %arg0[%c0, %c0_0] : memref<64x64xbf16, #tpu.memory_space<vmem>>, vector<64x64xbf16>
    %c0_1 = arith.constant 0 : index
    %c0_2 = arith.constant 0 : index
    %1 = vector.load %arg1[%c0_1, %c0_2] : memref<64x8xbf16, #tpu.memory_space<vmem>>, vector<64x8xbf16>
    %c0_3 = arith.constant 0 : index
    %c0_4 = arith.constant 0 : index
    %2 = vector.load %arg3[%c0_3, %c0_4] : memref<8x32xbf16, #tpu.memory_space<vmem>>, vector<8x32xbf16>
    %cst = arith.constant dense<0.000000e+00> : vector<64x8xf32>
    %3 = tpu.matmul %0, %1, %cst {dimension_numbers = #tpu.dot_dimension_numbers<[1], [0], [0], [1], [0, 0, 1, 1], [], []>} : vector<64x64xbf16>, vector<64x8xbf16>, vector<64x8xf32> -> vector<64x8xf32>
    %4 = arith.truncf %3 : vector<64x8xf32> to vector<64x8xbf16>
    %cst_5 = arith.constant dense<0.000000e+00> : vector<64x32xf32>
    %5 = tpu.matmul %4, %2, %cst_5 {dimension_numbers = #tpu.dot_dimension_numbers<[1], [0], [0], [1], [0, 0, 1, 1], [], []>} : vector<64x8xbf16>, vector<8x32xbf16>, vector<64x32xf32> -> vector<64x32xf32>
    %cst_6 = arith.constant 0.000000e+00 : f32
    %6 = vector.broadcast %cst_6 : f32 to vector<64x32xf32>
    %7 = arith.cmpf ogt, %5, %6 : vector<64x32xf32>
    %cst_7 = arith.constant 0.00999999977 : f32
    %8 = vector.broadcast %cst_7 : f32 to vector<64x32xf32>
    %9 = arith.mulf %8, %5 : vector<64x32xf32>
    %10 = arith.select %7, %5, %9 : vector<64x32xi1>, vector<64x32xf32>
    %c0_8 = arith.constant 0 : index
    %c0_9 = arith.constant 0 : index
    %11 = vector.load %arg4[%c0_8, %c0_9] : memref<32x32xbf16, #tpu.memory_space<vmem>>, vector<32x32xbf16>
    %12 = arith.truncf %10 : vector<64x32xf32> to vector<64x32xbf16>
    %cst_10 = arith.constant dense<0.000000e+00> : vector<64x32xf32>
    %13 = tpu.matmul %0, %12, %cst_10 {dimension_numbers = #tpu.dot_dimension_numbers<[1], [0], [0], [1], [0, 0, 1, 1], [], []>} : vector<64x64xbf16>, vector<64x32xbf16>, vector<64x32xf32> -> vector<64x32xf32>
    %14 = arith.truncf %13 : vector<64x32xf32> to vector<64x32xbf16>
    %cst_11 = arith.constant dense<0.000000e+00> : vector<64x32xf32>
    %15 = tpu.matmul %14, %11, %cst_11 {dimension_numbers = #tpu.dot_dimension_numbers<[1], [0], [0], [1], [0, 0, 1, 1], [], []>} : vector<64x32xbf16>, vector<32x32xbf16>, vector<64x32xf32> -> vector<64x32xf32>
    %cst_12 = arith.constant 0.000000e+00 : f32
    %16 = vector.broadcast %cst_12 : f32 to vector<64x32xf32>
    %17 = arith.cmpf ogt, %15, %16 : vector<64x32xf32>
    %cst_13 = arith.constant 0.00999999977 : f32
    %18 = vector.broadcast %cst_13 : f32 to vector<64x32xf32>
    %19 = arith.mulf %18, %15 : vector<64x32xf32>
    %20 = arith.select %17, %15, %19 : vector<64x32xi1>, vector<64x32xf32>
    %c0_14 = arith.constant 0 : index
    %c0_15 = arith.constant 0 : index
    %21 = vector.load %arg5[%c0_14, %c0_15] : memref<32x32xbf16, #tpu.memory_space<vmem>>, vector<32x32xbf16>
    %22 = arith.truncf %20 : vector<64x32xf32> to vector<64x32xbf16>
    %cst_16 = arith.constant dense<0.000000e+00> : vector<64x32xf32>
    %23 = tpu.matmul %0, %22, %cst_16 {dimension_numbers = #tpu.dot_dimension_numbers<[1], [0], [0], [1], [0, 0, 1, 1], [], []>} : vector<64x64xbf16>, vector<64x32xbf16>, vector<64x32xf32> -> vector<64x32xf32>
    %24 = arith.truncf %23 : vector<64x32xf32> to vector<64x32xbf16>
    %cst_17 = arith.constant dense<0.000000e+00> : vector<64x32xf32>
    %25 = tpu.matmul %24, %21, %cst_17 {dimension_numbers = #tpu.dot_dimension_numbers<[1], [0], [0], [1], [0, 0, 1, 1], [], []>} : vector<64x32xbf16>, vector<32x32xbf16>, vector<64x32xf32> -> vector<64x32xf32>
    %cst_18 = arith.constant 0.000000e+00 : f32
    %26 = vector.broadcast %cst_18 : f32 to vector<64x32xf32>
    %27 = arith.cmpf ogt, %25, %26 : vector<64x32xf32>
    %cst_19 = arith.constant 0.00999999977 : f32
    %28 = vector.broadcast %cst_19 : f32 to vector<64x32xf32>
    %29 = arith.mulf %28, %25 : vector<64x32xf32>
    %30 = arith.select %27, %25, %29 : vector<64x32xi1>, vector<64x32xf32>
    %c0_20 = arith.constant 0 : index
    %c0_21 = arith.constant 0 : index
    %31 = vector.load %arg6[%c0_20, %c0_21] : memref<32x32xbf16, #tpu.memory_space<vmem>>, vector<32x32xbf16>
    %32 = arith.truncf %30 : vector<64x32xf32> to vector<64x32xbf16>
    %cst_22 = arith.constant dense<0.000000e+00> : vector<64x32xf32>
    %33 = tpu.matmul %0, %32, %cst_22 {dimension_numbers = #tpu.dot_dimension_numbers<[1], [0], [0], [1], [0, 0, 1, 1], [], []>} : vector<64x64xbf16>, vector<64x32xbf16>, vector<64x32xf32> -> vector<64x32xf32>
    %34 = arith.truncf %33 : vector<64x32xf32> to vector<64x32xbf16>
    %cst_23 = arith.constant dense<0.000000e+00> : vector<64x32xf32>
    %35 = tpu.matmul %34, %31, %cst_23 {dimension_numbers = #tpu.dot_dimension_numbers<[1], [0], [0], [1], [0, 0, 1, 1], [], []>} : vector<64x32xbf16>, vector<32x32xbf16>, vector<64x32xf32> -> vector<64x32xf32>
    %cst_24 = arith.constant 0.000000e+00 : f32
    %36 = vector.broadcast %cst_24 : f32 to vector<64x32xf32>
    %37 = arith.cmpf ogt, %35, %36 : vector<64x32xf32>
    %cst_25 = arith.constant 0.00999999977 : f32
    %38 = vector.broadcast %cst_25 : f32 to vector<64x32xf32>
    %39 = arith.mulf %38, %35 : vector<64x32xf32>
    %40 = arith.select %37, %35, %39 : vector<64x32xi1>, vector<64x32xf32>
    %c0_26 = arith.constant 0 : index
    %c0_27 = arith.constant 0 : index
    %41 = vector.load %arg2[%c0_26, %c0_27] : memref<2x64xbf16, #tpu.memory_space<vmem>>, vector<2x64xbf16>
    %42 = math.absf %40 : vector<64x32xf32>
    %43 = arith.truncf %42 : vector<64x32xf32> to vector<64x32xbf16>
    %cst_28 = arith.constant dense<0.000000e+00> : vector<2x32xf32>
    %44 = tpu.matmul %41, %43, %cst_28 {dimension_numbers = #tpu.dot_dimension_numbers<[1], [0], [0], [1], [0, 0, 1, 1], [], []>} : vector<2x64xbf16>, vector<64x32xbf16>, vector<2x32xf32> -> vector<2x32xf32>
    %45 = arith.truncf %44 : vector<2x32xf32> to vector<2x32xbf16>
    %c0_29 = arith.constant 0 : index
    %c0_30 = arith.constant 0 : index
    %46 = vector.load %arg7[%c0_29, %c0_30] : memref<32x32xbf16, #tpu.memory_space<vmem>>, vector<32x32xbf16>
    %cst_31 = arith.constant dense<0.000000e+00> : vector<2x32xf32>
    %47 = tpu.matmul %45, %46, %cst_31 {dimension_numbers = #tpu.dot_dimension_numbers<[1], [0], [0], [1], [0, 0, 1, 1], [], []>} : vector<2x32xbf16>, vector<32x32xbf16>, vector<2x32xf32> -> vector<2x32xf32>
    %c0_32 = arith.constant 0 : index
    %c0_33 = arith.constant 0 : index
    %48 = vector.load %arg8[%c0_32, %c0_33] : memref<1x32xf32, #tpu.memory_space<vmem>>, vector<1x32xf32>
    %49 = vector.broadcast %48 : vector<1x32xf32> to vector<2x32xf32>
    %50 = arith.addf %47, %49 : vector<2x32xf32>
    %cst_34 = arith.constant 0.000000e+00 : f32
    %51 = vector.broadcast %cst_34 : f32 to vector<2x32xf32>
    %52 = arith.maximumf %50, %51 : vector<2x32xf32>
    %53 = arith.truncf %52 : vector<2x32xf32> to vector<2x32xbf16>
    %c0_35 = arith.constant 0 : index
    %c0_36 = arith.constant 0 : index
    %54 = vector.load %arg9[%c0_35, %c0_36] : memref<32x128xbf16, #tpu.memory_space<vmem>>, vector<32x128xbf16>
    %cst_37 = arith.constant dense<0.000000e+00> : vector<2x128xf32>
    %55 = tpu.matmul %53, %54, %cst_37 {dimension_numbers = #tpu.dot_dimension_numbers<[1], [0], [0], [1], [0, 0, 1, 1], [], []>} : vector<2x32xbf16>, vector<32x128xbf16>, vector<2x128xf32> -> vector<2x128xf32>
    %c0_38 = arith.constant 0 : index
    %c0_39 = arith.constant 0 : index
    %56 = vector.load %arg10[%c0_38, %c0_39] : memref<1x128xf32, #tpu.memory_space<vmem>>, vector<1x128xf32>
    %57 = vector.broadcast %56 : vector<1x128xf32> to vector<2x128xf32>
    %58 = arith.addf %55, %57 : vector<2x128xf32>
    %cst_40 = arith.constant dense<0xFF800000> : vector<2xf32>
    %59 = vector.multi_reduction <maximumf>, %58, %cst_40 [1] : vector<2x128xf32> to vector<2xf32>
    %60 = vector.shape_cast %59 : vector<2xf32> to vector<2x1xf32>
    %61 = vector.broadcast %60 : vector<2x1xf32> to vector<2x128xf32>
    %62 = arith.subf %58, %61 : vector<2x128xf32>
    %63 = math.exp %62 : vector<2x128xf32>
    %cst_41 = arith.constant dense<0.000000e+00> : vector<2xf32>
    %64 = vector.multi_reduction <add>, %63, %cst_41 [1] : vector<2x128xf32> to vector<2xf32>
    %65 = vector.shape_cast %64 : vector<2xf32> to vector<2x1xf32>
    %66 = vector.broadcast %65 : vector<2x1xf32> to vector<2x128xf32>
    %67 = arith.divf %63, %66 : vector<2x128xf32>
    %c0_42 = arith.constant 0 : index
    %c0_43 = arith.constant 0 : index
    %68 = vector.load %arg11[%c0_42, %c0_43] : memref<2x128xf32, #tpu.memory_space<vmem>>, vector<2x128xf32>
    tpu.vector_store %arg11[%c0_42, %c0_43], %67 {strides = array<i32>} : memref<2x128xf32, #tpu.memory_space<vmem>>, vector<2x128xf32>,
    return
  }
}

</mosaic_0001>

<bundles_post_ra>
// kernel: flow_scn_forward.1
= control target key start
LH: loop header
LB: loop body
LE: loop exit
PB: predicated region body
PF: predicated region fallthrough
CT: control target
= control target key end

     0   :  { %s1061_s0 = inlined_call_operand.vmem [shape: bf16[64,64], index: 0, kind: input, shape index: {}]   ;;  %s1062_s1 = inlined_call_operand.vmem [shape: bf16[64,8], index: 1, kind: input, shape index: {}]   ;;  %s1063_s2 = inlined_call_operand.vmem [shape: bf16[2,64], index: 2, kind: input, shape index: {}]   ;;  %s1064_s3 = inlined_call_operand.vmem [shape: bf16[8,32], index: 3, kind: input, shape index: {}]   ;;  %s1065_s4 = inlined_call_operand.vmem [shape: bf16[32,32], index: 4, kind: input, shape index: {}]   ;;  %s1066_s5 = inlined_call_operand.vmem [shape: bf16[32,32], index: 5, kind: input, shape index: {}]   ;;  %s1067_s6 = inlined_call_operand.vmem [shape: bf16[32,32], index: 6, kind: input, shape index: {}]   ;;  %s1068_s7 = inlined_call_operand.vmem [shape: bf16[32,32], index: 7, kind: input, shape index: {}]   ;;  %s1069_s8 = inlined_call_operand.vmem [shape: f32[1,32], index: 8, kind: input, shape index: {}]   ;;  %s1070_s9 = inlined_call_operand.vmem [shape: bf16[32,128], index: 9, kind: input, shape index: {}]   ;;  %s1071_s10 = inlined_call_operand.vmem [shape: f32[1,128], index: 10, kind: input, shape index: {}]   ;;  %s1072_s11 = inlined_call_operand.hbm [shape: f32[2,128], index: 11, kind: output, shape index: {}]  }
   0x1   :  { %v832_v0 = vld [vmem:[%s1062_s1 + $0x18] sm:$0xff]  ;;  %v831_v1 = vld [vmem:[%s1062_s1 + $0x10] sm:$0xff] }
   0x2   :  { %118 = vmatpush.bf16.msra.mxu0 %v832_v0 }
   0x3   :  { %16 = vsyncpa [#allocation3], 0  ;;  %v830_v2 = vld [vmem:[%s1062_s1 + $0x8] sm:$0xff]  ;;  %v829_v3 = vld [vmem:[%s1062_s1] sm:$0xff]  ;;  %vm101_vm0 = vcmask 523264   ;;  %vm160_vm1 = vcmask 1043456  }
   0x4   :  { %v952_v4 = vld [vmem:[%s1061_s0] sm:$0xff]  ;;  %v959_v5 = vld [vmem:[%s1061_s0 + $0x8] sm:$0xff]  ;;  %v966_v6 = vld [vmem:[%s1061_s0 + $0x10] sm:$0xff]  ;;  %vm147_vm2 = vcmask 64512   ;;  %vm270_vm11 = vcmask 261120  }
   0x5   :  { %v973_v7 = vld [vmem:[%s1061_s0 + $0x18] sm:$0xff]  ;;  %v56_v8 = vld [vmem:[%s1064_s3] sm:$0xf]  ;;  %v834_v50 = vld [vmem:[%s1065_s4 + $0x8] sm:$0xff]  ;;  %s709_s0 = sshll.u32 %s1072_s11, 4  ;;  %s710_s0 = int_to_ptr.hbm [resolvable:$true] %s709_s0 }
   0x6   :  { %119 = vmatpush.bf16.msra.mxu0 %v831_v1  ;;  %v162_v9 = vsel %vm160_vm1, %v56_v8, 0  ;;  %289 = vmatpush.bf16.msra.mxu3 %v834_v50  ;;  %v833_v51 = vld [vmem:[%s1065_s4] sm:$0xff] }
   0x7   :  { %171 = vmatpush.bf16.msra.mxu1 %v162_v9 }
   0xa   :  { %120 = vmatpush.bf16.msra.mxu0 %v830_v2  ;;  %290 = vmatpush.bf16.msra.mxu3 %v833_v51 }
   0xe   :  { %121 = vmatpush.bf16.msra.mxu0 %v829_v3 }
  0x11   :  { %750 = vmatmul.msk.bf16.vlgmr.msra.gmra.mxu0 %vm101_vm0, %v952_v4 }
  0x21   :  { %751 = vmatmul.msk.bf16.gmra.mxu0 %vm101_vm0, %v959_v5 }
  0x31   :  { %752 = vmatmul.msk.bf16.gmra.mxu0 %vm101_vm0, %v966_v6 }
  0x41   :  { %753 = vmatmul.msk.bf16.gmra.mxu0 %vm101_vm0, %v973_v7 }
  0x8e   :  { %v123_v10 = vpop.f32.mrf.mxu0 }
  0x96   :  { %v125_v11 = vpop.f32.mrf.mxu0 }
  0x97   :  { %v143_v12 = vpack.c.bf16 %v125_v11, %v123_v10 }
  0x99   :  { %754 = vmatmul.msk.bf16.vlgmr.msra.gmra.mxu1 %vm147_vm2, %v143_v12 }
  0x9e   :  { %v128_v13 = vpop.f32.mrf.mxu0 }
  0xa6   :  { %v130_v14 = vpop.f32.mrf.mxu0 }
  0xa7   :  { %v144_v15 = vpack.c.bf16 %v130_v14, %v128_v13 }
  0xa9   :  { %755 = vmatmul.msk.bf16.gmra.mxu1 %vm147_vm2, %v144_v15 }
  0xae   :  { %v133_v16 = vpop.f32.mrf.mxu0 }
  0xb6   :  { %v135_v17 = vpop.f32.mrf.mxu0 }
  0xb7   :  { %v145_v18 = vpack.c.bf16 %v135_v17, %v133_v16 }
  0xb9   :  { %756 = vmatmul.msk.bf16.gmra.mxu1 %vm147_vm2, %v145_v18 }
  0xbe   :  { %v138_v19 = vpop.f32.mrf.mxu0 }
  0xc6   :  { %v140_v20 = vpop.f32.mrf.mxu0 }
  0xc7   :  { %v146_v21 = vpack.c.bf16 %v140_v20, %v138_v19 }
  0xc9   :  { %757 = vmatmul.msk.bf16.gmra.mxu1 %vm147_vm2, %v146_v21 }
 0x116   :  { %v173_v22 = vpop.f32.mrf.mxu1 }
 0x117   :  { %v201_v44 = vmul.f32 0.01, %v173_v22  ;;  %vm193_vm10 = vcmp.gt.f32.partialorder %v173_v22, 0.0 }
 0x119   :  { %v209_v48 = vsel %vm193_vm10, %v173_v22, %v201_v44 }
 0x11e   :  { %v175_v23 = vpop.f32.mrf.mxu1 }
 0x11f   :  { %v202_v42 = vmul.f32 0.01, %v175_v23  ;;  %vm194_vm9 = vcmp.gt.f32.partialorder %v175_v23, 0.0 }
 0x121   :  { %v210_v47 = vsel %vm194_vm9, %v175_v23, %v202_v42 }
 0x122   :  { %v221_v49 = vpack.c.bf16 %v210_v47, %v209_v48 }
 0x126   :  { %v178_v24 = vpop.f32.mrf.mxu1 }
 0x127   :  { %v203_v39 = vmul.f32 0.01, %v178_v24  ;;  %vm195_vm8 = vcmp.gt.f32.partialorder %v178_v24, 0.0 }
 0x129   :  { %v211_v45 = vsel %vm195_vm8, %v178_v24, %v203_v39 }
 0x12e   :  { %v180_v25 = vpop.f32.mrf.mxu1 }
 0x12f   :  { %v204_v37 = vmul.f32 0.01, %v180_v25  ;;  %vm196_vm7 = vcmp.gt.f32.partialorder %v180_v25, 0.0 }
 0x131   :  { %v212_v43 = vsel %vm196_vm7, %v180_v25, %v204_v37 }
 0x132   :  { %v222_v46 = vpack.c.bf16 %v212_v43, %v211_v45 }
 0x136   :  { %v183_v26 = vpop.f32.mrf.mxu1 }
 0x137   :  { %v205_v33 = vmul.f32 0.01, %v183_v26  ;;  %vm197_vm6 = vcmp.gt.f32.partialorder %v183_v26, 0.0 }
 0x139   :  { %v213_v40 = vsel %vm197_vm6, %v183_v26, %v205_v33  ;;  %v835_v33 = vld [vmem:[%s1066_s5] sm:$0xff] }
 0x13e   :  { %v185_v27 = vpop.f32.mrf.mxu1 }
 0x13f   :  { %v206_v31 = vmul.f32 0.01, %v185_v27  ;;  %vm198_vm5 = vcmp.gt.f32.partialorder %v185_v27, 0.0 }
 0x141   :  { %v214_v38 = vsel %vm198_vm5, %v185_v27, %v206_v31 }
 0x142   :  { %v223_v41 = vpack.c.bf16 %v214_v38, %v213_v40 }
 0x146   :  { %v188_v28 = vpop.f32.mrf.mxu1 }
 0x147   :  { %v207_v29 = vmul.f32 0.01, %v188_v28  ;;  %vm199_vm3 = vcmp.gt.f32.partialorder %v188_v28, 0.0 }
 0x149   :  { %v215_v34 = vsel %vm199_vm3, %v188_v28, %v207_v29 }
 0x14e   :  { %v190_v30 = vpop.f32.mrf.mxu1 }
 0x14f   :  { %v208_v32 = vmul.f32 0.01, %v190_v30  ;;  %vm200_vm4 = vcmp.gt.f32.partialorder %v190_v30, 0.0 }
 0x151   :  { %v216_v35 = vsel %vm200_vm4, %v190_v30, %v208_v32  ;;  %v836_v32 = vld [vmem:[%s1066_s5 + $0x8] sm:$0xff] }
 0x152   :  { %v224_v36 = vpack.c.bf16 %v216_v35, %v215_v34  ;;  %407 = vmatpush.bf16.msrb.mxu3 %v836_v32 }
 0x154   :  { %229 = vmatpush.bf16.msra.mxu2 %v224_v36 }
 0x156   :  { %408 = vmatpush.bf16.msrb.mxu3 %v835_v33 }
 0x158   :  { %230 = vmatpush.bf16.msra.mxu2 %v223_v41 }
 0x15c   :  { %231 = vmatpush.bf16.msra.mxu2 %v222_v46 }
 0x160   :  { %232 = vmatpush.bf16.msra.mxu2 %v221_v49 }
 0x163   :  { %758 = vmatmul.msk.bf16.vlgmr.msra.gmra.mxu2 %vm101_vm0, %v952_v4 }
 0x173   :  { %759 = vmatmul.msk.bf16.gmra.mxu2 %vm101_vm0, %v959_v5 }
 0x183   :  { %760 = vmatmul.msk.bf16.gmra.mxu2 %vm101_vm0, %v966_v6 }
 0x193   :  { %761 = vmatmul.msk.bf16.gmra.mxu2 %vm101_vm0, %v973_v7 }
 0x1e6   :  { %v234_v52 = vpop.f32.mrf.mxu2 }
 0x1ee   :  { %v236_v53 = vpop.f32.mrf.mxu2 }
 0x1ef   :  { %v254_v54 = vpack.c.bf16 %v236_v53, %v234_v52 }
 0x1f1   :  { %770 = vmatmul.msk.bf16.vlgmr.msra.gmra.mxu3 %vm270_vm11, %v254_v54 }
 0x1f6   :  { %v239_v55 = vpop.f32.mrf.mxu2 }
 0x1fe   :  { %v241_v56 = vpop.f32.mrf.mxu2 }
 0x1ff   :  { %v255_v57 = vpack.c.bf16 %v241_v56, %v239_v55 }
 0x201   :  { %771 = vmatmul.msk.bf16.gmra.mxu3 %vm270_vm11, %v255_v57 }
 0x206   :  { %v244_v58 = vpop.f32.mrf.mxu2 }
 0x20e   :  { %v246_v59 = vpop.f32.mrf.mxu2 }
 0x20f   :  { %v256_v60 = vpack.c.bf16 %v246_v59, %v244_v58 }
 0x211   :  { %772 = vmatmul.msk.bf16.gmra.mxu3 %vm270_vm11, %v256_v60 }
 0x216   :  { %v249_v61 = vpop.f32.mrf.mxu2 }
 0x21e   :  { %v251_v62 = vpop.f32.mrf.mxu2 }
 0x21f   :  { %v257_v63 = vpack.c.bf16 %v251_v62, %v249_v61 }
 0x221   :  { %773 = vmatmul.msk.bf16.gmra.mxu3 %vm270_vm11, %v257_v63 }
 0x274   :  { %v292_v0 = vpop.f32.mrf.mxu3 }
 0x275   :  { %v320_v26 = vmul.f32 0.01, %v292_v0  ;;  %vm312_vm4 = vcmp.gt.f32.partialorder %v292_v0, 0.0 }
 0x277   :  { %v328_v30 = vsel %vm312_vm4, %v292_v0, %v320_v26 }
 0x27c   :  { %v294_v1 = vpop.f32.mrf.mxu3 }
 0x27d   :  { %v321_v24 = vmul.f32 0.01, %v294_v1  ;;  %vm313_vm3 = vcmp.gt.f32.partialorder %v294_v1, 0.0 }
 0x27f   :  { %v329_v29 = vsel %vm313_vm3, %v294_v1, %v321_v24 }
 0x280   :  { %v340_v31 = vpack.c.bf16 %v329_v29, %v328_v30  ;;  %v840_v30 = vld [vmem:[%s1068_s7 + $0x8] sm:$0xff] }
 0x281   :  { %631 = vmatpush.bf16.msra.mxu3 %v840_v30 }
 0x284   :  { %v297_v2 = vpop.f32.mrf.mxu3 }
 0x285   :  { %v322_v21 = vmul.f32 0.01, %v297_v2  ;;  %vm314_vm2 = vcmp.gt.f32.partialorder %v297_v2, 0.0 }
 0x287   :  { %v330_v27 = vsel %vm314_vm2, %v297_v2, %v322_v21 }
 0x28c   :  { %v299_v3 = vpop.f32.mrf.mxu3 }
 0x28d   :  { %v323_v19 = vmul.f32 0.01, %v299_v3  ;;  %vm315_vm1 = vcmp.gt.f32.partialorder %v299_v3, 0.0 }
 0x28f   :  { %v331_v25 = vsel %vm315_vm1, %v299_v3, %v323_v19 }
 0x290   :  { %v341_v28 = vpack.c.bf16 %v331_v25, %v330_v27 }
 0x294   :  { %v302_v8 = vpop.f32.mrf.mxu3 }
 0x295   :  { %v324_v15 = vmul.f32 0.01, %v302_v8  ;;  %vm316_vm15 = vcmp.gt.f32.partialorder %v302_v8, 0.0 }
 0x297   :  { %v332_v22 = vsel %vm316_vm15, %v302_v8, %v324_v15  ;;  %v837_v15 = vld [vmem:[%s1067_s6] sm:$0xff] }
 0x29c   :  { %v304_v9 = vpop.f32.mrf.mxu3 }
 0x29d   :  { %v325_v13 = vmul.f32 0.01, %v304_v9  ;;  %vm317_vm14 = vcmp.gt.f32.partialorder %v304_v9, 0.0 }
 0x29f   :  { %v333_v20 = vsel %vm317_vm14, %v304_v9, %v325_v13 }
 0x2a0   :  { %v342_v23 = vpack.c.bf16 %v333_v20, %v332_v22 }
 0x2a4   :  { %v307_v10 = vpop.f32.mrf.mxu3 }
 0x2a5   :  { %v326_v11 = vmul.f32 0.01, %v307_v10  ;;  %vm318_vm12 = vcmp.gt.f32.partialorder %v307_v10, 0.0 }
 0x2a7   :  { %v334_v16 = vsel %vm318_vm12, %v307_v10, %v326_v11 }
 0x2ac   :  { %v309_v12 = vpop.f32.mrf.mxu3 }
 0x2ad   :  { %vm319_vm13 = vcmp.gt.f32.partialorder %v309_v12, 0.0  ;;  %v327_v14 = vmul.f32 0.01, %v309_v12 }
 0x2af   :  { %v335_v17 = vsel %vm319_vm13, %v309_v12, %v327_v14  ;;  %v838_v14 = vld [vmem:[%s1067_s6 + $0x8] sm:$0xff] }
 0x2b0   :  { %v343_v18 = vpack.c.bf16 %v335_v17, %v334_v16  ;;  %525 = vmatpush.bf16.msrb.mxu2 %v838_v14  ;;  %v845_v14 = vld [vmem:[%s1071_s10] ss:$0 sm:$0xff] }
 0x2b2   :  { %348 = vmatpush.bf16.msrb.mxu1 %v343_v18 }
 0x2b4   :  { %526 = vmatpush.bf16.msrb.mxu2 %v837_v15 }
 0x2b6   :  { %349 = vmatpush.bf16.msrb.mxu1 %v342_v23 }
 0x2ba   :  { %350 = vmatpush.bf16.msrb.mxu1 %v341_v28 }
 0x2be   :  { %351 = vmatpush.bf16.msrb.mxu1 %v340_v31 }
 0x2c1   :  { %774 = vmatmul.msk.bf16.vlgmr.msrb.gmra.mxu1 %vm101_vm0, %v952_v4 }
 0x2d1   :  { %775 = vmatmul.msk.bf16.gmra.mxu1 %vm101_vm0, %v959_v5 }
 0x2e1   :  { %776 = vmatmul.msk.bf16.gmra.mxu1 %vm101_vm0, %v966_v6 }
 0x2f1   :  { %777 = vmatmul.msk.bf16.gmra.mxu1 %vm101_vm0, %v973_v7 }
 0x33e   :  { %v353_v34 = vpop.f32.mrf.mxu1 }
 0x346   :  { %v355_v35 = vpop.f32.mrf.mxu1 }
 0x347   :  { %v373_v36 = vpack.c.bf16 %v355_v35, %v353_v34 }
 0x349   :  { %786 = vmatmul.msk.bf16.vlgmr.msrb.gmra.mxu3 %vm270_vm11, %v373_v36 }
 0x34e   :  { %v358_v37 = vpop.f32.mrf.mxu1 }
 0x356   :  { %v360_v38 = vpop.f32.mrf.mxu1 }
 0x357   :  { %v374_v39 = vpack.c.bf16 %v360_v38, %v358_v37 }
 0x359   :  { %787 = vmatmul.msk.bf16.gmra.mxu3 %vm270_vm11, %v374_v39 }
 0x35e   :  { %v363_v40 = vpop.f32.mrf.mxu1 }
 0x366   :  { %v365_v41 = vpop.f32.mrf.mxu1 }
 0x367   :  { %v375_v42 = vpack.c.bf16 %v365_v41, %v363_v40 }
 0x369   :  { %788 = vmatmul.msk.bf16.gmra.mxu3 %vm270_vm11, %v375_v42 }
 0x36e   :  { %v368_v43 = vpop.f32.mrf.mxu1 }
 0x376   :  { %v370_v44 = vpop.f32.mrf.mxu1 }
 0x377   :  { %v376_v45 = vpack.c.bf16 %v370_v44, %v368_v43 }
 0x379   :  { %789 = vmatmul.msk.bf16.gmra.mxu3 %vm270_vm11, %v376_v45 }
 0x3cc   :  { %v410_v46 = vpop.f32.mrf.mxu3 }
 0x3cd   :  { %v438_v8 = vmul.f32 0.01, %v410_v46  ;;  %vm430_vm13 = vcmp.gt.f32.partialorder %v410_v46, 0.0 }
 0x3cf   :  { %v446_v12 = vsel %vm430_vm13, %v410_v46, %v438_v8  ;;  %v844_v8 = vld [vmem:[%s1069_s8] ss:$0 sm:$0xff]  ;;  %s876_s8 = smov [#allocation2]  }
 0x3d4   :  { %v412_v47 = vpop.f32.mrf.mxu3 }
 0x3d5   :  { %v439_v2 = vmul.f32 0.01, %v412_v47  ;;  %vm431_vm12 = vcmp.gt.f32.partialorder %v412_v47, 0.0 }
 0x3d7   :  { %v447_v11 = vsel %vm431_vm12, %v412_v47, %v439_v2 }
 0x3d8   :  { %v458_v13 = vpack.c.bf16 %v447_v11, %v446_v12 }
 0x3dc   :  { %v415_v48 = vpop.f32.mrf.mxu3 }
 0x3dd   :  { %v440_v63 = vmul.f32 0.01, %v415_v48  ;;  %vm432_vm10 = vcmp.gt.f32.partialorder %v415_v48, 0.0 }
 0x3df   :  { %v448_v9 = vsel %vm432_vm10, %v415_v48, %v440_v63  ;;  %v842_v63 = vld [vmem:[%s1070_s9 + $0x8] sm:$0xff] }
 0x3e4   :  { %v417_v49 = vpop.f32.mrf.mxu3 }
 0x3e5   :  { %v441_v61 = vmul.f32 0.01, %v417_v49  ;;  %vm433_vm9 = vcmp.gt.f32.partialorder %v417_v49, 0.0 }
 0x3e7   :  { %v449_v3 = vsel %vm433_vm9, %v417_v49, %v441_v61  ;;  %v572_v61 = vld [vmem:[%s1063_s2] sm:$0x1] }
 0x3e8   :  { %v459_v10 = vpack.c.bf16 %v449_v3, %v448_v9  ;;  %v841_v3 = vld [vmem:[%s1070_s9] sm:$0xff]  ;;  %s707_s9 = sshll.u32 %s876_s8, 4  ;;  %s708_s9 = int_to_ptr.vmem [resolvable:$true] %s707_s9 }
 0x3ec   :  { %v420_v50 = vpop.f32.mrf.mxu3 }
 0x3ed   :  { %v442_v57 = vmul.f32 0.01, %v420_v50  ;;  %vm434_vm8 = vcmp.gt.f32.partialorder %v420_v50, 0.0 }
 0x3ef   :  { %v450_v0 = vsel %vm434_vm8, %v420_v50, %v442_v57 }
 0x3f4   :  { %v422_v51 = vpop.f32.mrf.mxu3 }
 0x3f5   :  { %v443_v55 = vmul.f32 0.01, %v422_v51  ;;  %vm435_vm7 = vcmp.gt.f32.partialorder %v422_v51, 0.0 }
 0x3f7   :  { %v451_v62 = vsel %vm435_vm7, %v422_v51, %v443_v55 }
 0x3f8   :  { %v460_v1 = vpack.c.bf16 %v451_v62, %v450_v0  ;;  %v839_v62 = vld [vmem:[%s1068_s7] sm:$0xff] }
 0x3f9   :  { %632 = vmatpush.bf16.msra.mxu3 %v839_v62 }
 0x3fc   :  { %v425_v52 = vpop.f32.mrf.mxu3 }
 0x3fd   :  { %v444_v53 = vmul.f32 0.01, %v425_v52  ;;  %vm436_vm5 = vcmp.gt.f32.partialorder %v425_v52, 0.0 }
 0x3ff   :  { %v452_v58 = vsel %vm436_vm5, %v425_v52, %v444_v53 }
 0x404   :  { %v427_v54 = vpop.f32.mrf.mxu3 }
 0x405   :  { %vm437_vm6 = vcmp.gt.f32.partialorder %v427_v54, 0.0  ;;  %v445_v56 = vmul.f32 0.01, %v427_v54 }
 0x407   :  { %v453_v59 = vsel %vm437_vm6, %v427_v54, %v445_v56 }
 0x408   :  { %v461_v60 = vpack.c.bf16 %v453_v59, %v452_v58 }
 0x40a   :  { %466 = vmatpush.bf16.msrb.mxu0 %v461_v60 }
 0x40e   :  { %467 = vmatpush.bf16.msrb.mxu0 %v460_v1 }
 0x412   :  { %468 = vmatpush.bf16.msrb.mxu0 %v459_v10 }
 0x416   :  { %469 = vmatpush.bf16.msrb.mxu0 %v458_v13 }
 0x419   :  { %790 = vmatmul.msk.bf16.vlgmr.msrb.gmra.mxu0 %vm101_vm0, %v952_v4 }
 0x41a   :  { %669 = vmatpush.bf16.msra.mxu0 %v842_v63 }
 0x41e   :  { %670 = vmatpush.bf16.msra.mxu0 %v841_v3 }
 0x429   :  { %791 = vmatmul.msk.bf16.gmra.mxu0 %vm101_vm0, %v959_v5 }
 0x439   :  { %792 = vmatmul.msk.bf16.gmra.mxu0 %vm101_vm0, %v966_v6 }
 0x449   :  { %793 = vmatmul.msk.bf16.gmra.mxu0 %vm101_vm0, %v973_v7 }
 0x496   :  { %v471_v4 = vpop.f32.mrf.mxu0 }
 0x49e   :  { %v473_v16 = vpop.f32.mrf.mxu0 }
 0x49f   :  { %v491_v17 = vpack.c.bf16 %v473_v16, %v471_v4 }
 0x4a1   :  { %802 = vmatmul.msk.bf16.vlgmr.msrb.gmra.mxu2 %vm270_vm11, %v491_v17 }
 0x4a6   :  { %v476_v5 = vpop.f32.mrf.mxu0 }
 0x4ae   :  { %v478_v18 = vpop.f32.mrf.mxu0 }
 0x4af   :  { %v492_v19 = vpack.c.bf16 %v478_v18, %v476_v5 }
 0x4b1   :  { %803 = vmatmul.msk.bf16.gmra.mxu2 %vm270_vm11, %v492_v19 }
 0x4b6   :  { %v481_v20 = vpop.f32.mrf.mxu0 }
 0x4be   :  { %v483_v6 = vpop.f32.mrf.mxu0 }
 0x4bf   :  { %v493_v21 = vpack.c.bf16 %v483_v6, %v481_v20 }
 0x4c1   :  { %804 = vmatmul.msk.bf16.gmra.mxu2 %vm270_vm11, %v493_v21 }
 0x4c6   :  { %v486_v7 = vpop.f32.mrf.mxu0 }
 0x4ce   :  { %v488_v22 = vpop.f32.mrf.mxu0 }
 0x4cf   :  { %v494_v23 = vpack.c.bf16 %v488_v22, %v486_v7 }
 0x4d1   :  { %805 = vmatmul.msk.bf16.gmra.mxu2 %vm270_vm11, %v494_v23 }
 0x524   :  { %v528_v24 = vpop.f32.mrf.mxu2 }
 0x525   :  { %v556_v50 = vmul.f32 0.01, %v528_v24  ;;  %vm548_vm6 = vcmp.gt.f32.partialorder %v528_v24, 0.0 }
 0x527   :  { %v564_v56 = vsel %vm548_vm6, %v528_v24, %v556_v50 }
 0x528   :  { %v573_v59 = vand.u32 2147483647, %v564_v56 }
 0x52c   :  { %v530_v25 = vpop.f32.mrf.mxu2 }
 0x52d   :  { %v557_v47 = vmul.f32 0.01, %v530_v25  ;;  %vm549_vm5 = vcmp.gt.f32.partialorder %v530_v25, 0.0 }
 0x52f   :  { %v565_v54 = vsel %vm549_vm5, %v530_v25, %v557_v47 }
 0x530   :  { %v574_v57 = vand.u32 2147483647, %v565_v54 }
 0x532   :  { %v581_v60 = vpack.c.bf16 %v574_v57, %v573_v59 }
 0x534   :  { %v533_v26 = vpop.f32.mrf.mxu2 }
 0x535   :  { %v558_v43 = vmul.f32 0.01, %v533_v26  ;;  %vm550_vm4 = vcmp.gt.f32.partialorder %v533_v26, 0.0 }
 0x537   :  { %v566_v51 = vsel %vm550_vm4, %v533_v26, %v558_v43 }
 0x538   :  { %v575_v55 = vand.u32 2147483647, %v566_v51 }
 0x53c   :  { %v535_v27 = vpop.f32.mrf.mxu2 }
 0x53d   :  { %v559_v38 = vmul.f32 0.01, %v535_v27  ;;  %vm551_vm3 = vcmp.gt.f32.partialorder %v535_v27, 0.0 }
 0x53f   :  { %v567_v48 = vsel %vm551_vm3, %v535_v27, %v559_v38 }
 0x540   :  { %v576_v52 = vand.u32 2147483647, %v567_v48 }
 0x542   :  { %v582_v58 = vpack.c.bf16 %v576_v52, %v575_v55 }
 0x544   :  { %v538_v28 = vpop.f32.mrf.mxu2 }
 0x545   :  { %v560_v35 = vmul.f32 0.01, %v538_v28  ;;  %vm552_vm2 = vcmp.gt.f32.partialorder %v538_v28, 0.0 }
 0x547   :  { %v568_v44 = vsel %vm552_vm2, %v538_v28, %v560_v35 }
 0x548   :  { %v577_v49 = vand.u32 2147483647, %v568_v44 }
 0x54c   :  { %v540_v29 = vpop.f32.mrf.mxu2 }
 0x54d   :  { %v561_v33 = vmul.f32 0.01, %v540_v29  ;;  %vm553_vm15 = vcmp.gt.f32.partialorder %v540_v29, 0.0 }
 0x54f   :  { %v569_v39 = vsel %vm553_vm15, %v540_v29, %v561_v33 }
 0x550   :  { %v578_v45 = vand.u32 2147483647, %v569_v39 }
 0x552   :  { %v583_v53 = vpack.c.bf16 %v578_v45, %v577_v49 }
 0x554   :  { %v543_v31 = vpop.f32.mrf.mxu2 }
 0x555   :  { %v562_v32 = vmul.f32 0.01, %v543_v31  ;;  %vm554_vm14 = vcmp.gt.f32.partialorder %v543_v31, 0.0 }
 0x557   :  { %v570_v36 = vsel %vm554_vm14, %v543_v31, %v562_v32 }
 0x558   :  { %v579_v41 = vand.u32 2147483647, %v570_v36 }
 0x55c   :  { %v545_v34 = vpop.f32.mrf.mxu2 }
 0x55d   :  { %vm555_vm1 = vcmp.gt.f32.partialorder %v545_v34, 0.0  ;;  %v563_v37 = vmul.f32 0.01, %v545_v34 }
 0x55f   :  { %v571_v40 = vsel %vm555_vm1, %v545_v34, %v563_v37 }
 0x560   :  { %v580_v42 = vand.u32 2147483647, %v571_v40 }
 0x562   :  { %v584_v46 = vpack.c.bf16 %v580_v42, %v579_v41 }
 0x564   :  { %592 = vmatpush.bf16.msra.mxu1 %v584_v46 }
 0x568   :  { %593 = vmatpush.bf16.msra.mxu1 %v583_v53 }
 0x56c   :  { %594 = vmatpush.bf16.msra.mxu1 %v582_v58 }
 0x570   :  { %595 = vmatpush.bf16.msra.mxu1 %v581_v60 }
 0x573   :  { %806 = vmatmul.msk.bf16.vlgmr.msra.gmra.mxu1 %vm101_vm0, %v572_v61  ;;  %vm676_vm0 = vcmask 1041408  }
 0x5f0   :  { %v597_v0 = vpop.f32.mrf.mxu1 }
 0x5f1   :  { %v601_v1 = vpack.c.bf16 %v597_v0, %v597_v0 }
 0x5f3   :  { %815 = vmatmul.msk.bf16.vlgmr.msra.gmra.mxu3 %vm270_vm11, %v601_v1 }
 0x5f8   :  { %v599_v2 = vpop.f32.mrf.mxu1 }
 0x676   :  { %v634_v9 = vpop.f32.mrf.mxu3 }
 0x677   :  { %v635_v10 = vadd.f32 %v844_v8, %v634_v9 }
 0x679   :  { %v638_v11 = vmax.f32 %v635_v10, 0.0 }
 0x67b   :  { %v639_v12 = vpack.c.bf16 %v638_v11, %v638_v11 }
 0x67d   :  { %824 = vmatmul.msk.bf16.vlgmr.msra.gmra.mxu0 %vm270_vm11, %v639_v12 }
 0x67e   :  { %v636_v13 = vpop.f32.mrf.mxu3 }
 0x6fa   :  { %v672_v15 = vpop.f32.mrf.mxu0 }
 0x6fb   :  { %v673_v4 = vadd.f32 %v845_v14, %v672_v15 }
 0x6fd   :  { %v677_v16 = vsel %vm676_vm0, %v673_v4, -inf }
 0x6fe   :  { %678 = vmax.xlane.f32.xlu0 %v677_v16 }
 0x702   :  { %v674_v17 = vpop.f32.mrf.mxu0 }
 0x771   :  { %v679_v5 = vpop.xlane.xlu0 %678 }
 0x772   :  { %v680_v18 = vsub.f32 %v673_v4, %v679_v5 }
 0x774   :  { %v681_v19 = vmul.f32 1.442695, %v680_v18 }
 0x776   :  { %846 = vpow2.f32 %v681_v19 }
 0x77c   :  { %v847_v20 = vpop.eup %846 }
 0x77d   :  { %v683_v6 = vsel %vm676_vm0, %v847_v20, 0.0 }
 0x77e   :  { %684 = vadd.xlane.f32.xlu0 %v683_v6 }
 0x7f1   :  { %v685_v21 = vpop.xlane.xlu0 %684 }
 0x7f2   :  { %848 = vrcp.f32 %v685_v21  ;;  %v697_v24 = vand.u32 2147483648, %v685_v21  ;;  %v695_v26 = vand.u32 2147483647, %v685_v21  ;;  %vm691_vm7 = vweird.f32 %v685_v21 }
 0x7f4   :  { %v698_v28 = vor.u32 1.1754944e-38, %v697_v24  ;;  %vm696_vm9 = vcmp.eq.f32.partialorder %v695_v26, 8.507059e+37 }
 0x7f8   :  { %v849_v7 = vpop.eup %848 }
 0x7f9   :  { %v687_v22 = vmul.f32 %v849_v7, %v685_v21  ;;  %vm692_vm11 = vweird.f32 %v849_v7 }
 0x7fa   :  { %vm693_vm8 = vmor %vm691_vm7, %vm692_vm11 }
 0x7fb   :  { %v688_v23 = vsub.f32 1.0, %v687_v22 }
 0x7fd   :  { %v689_v25 = vmul.f32 %v849_v7, %v688_v23 }
 0x7ff   :  { %v690_v27 = vadd.f32 %v849_v7, %v689_v25 }
 0x801   :  { %v694_v29 = vsel %vm693_vm8, %v849_v7, %v690_v27 }
 0x802   :  { %v699_v30 = vsel %vm696_vm9, %v698_v28, %v694_v29 }
 0x803   :  { %v700_v31 = vmul.f32 %v847_v20, %v699_v30 }
 0x805   :  { %701 = vst [vmem:[#allocation2] sm:$0x3] %v700_v31 }
 0x806   :  { %712 = dma.vmem_to_hbm [thread:$0]  %s708_s9, 32, %s710_s0, [#allocation3]  }
 0x807   :  { %874 = dma.done.wait [#allocation3], 32  }
 0x808   :  { %875 = vsyncadd [#allocation3], 4294967264 }
 0x809   :  { %717 = vsyncpa [#allocation3], 1 }

</bundles_post_ra>
